<compile_context>
chip_gen: v5e
topology: v5e:2x2
jax: 0.10.0
libtpu: 0.0.40
codegen_flags: <defaults>
</compile_context>

<pallas_src>
import functools

import jax
import jax.numpy as jnp
from jax import lax
from jax.experimental import pallas as pl
from jax.experimental.pallas import tpu as pltpu


def gather_kernel(lin_ref, pt_ref, sel_ref):
    """One-hot-matmul batched index select.

    lin_ref : VMEM (1, tb)  int32   linearized row indices for this batch tile
    pt_ref  : VMEM (RR, N)          lane-dense permuted core (resident, constant block)
    sel_ref : VMEM (RR, tb)         transposed, lane-dense gather output tile
    """
    N = pt_ref.shape[1]
    tb = lin_ref.shape[1]
    # onehot[n, b] = 1.0 iff lin[b] == n   (VPU iota + compare, ~N*tb/1024 vregs)
    row_ids = lax.broadcasted_iota(jnp.int32, (N, tb), 0)
    onehot = (row_ids == lin_ref[...]).astype(pt_ref.dtype)
    # (RR, N) @ (N, tb) on the MXU; exact gather since one-hot weights are 0/1.
    sel_ref[...] = jnp.dot(
        pt_ref[...], onehot, preferred_element_type=jnp.float32
    ).astype(sel_ref.dtype)


def _round_up(x, m):
    return ((x + m - 1) // m) * m


def tt_forward(p, indices, n_list, *, batch_tile=512):
    r1, n1, n2, r2 = p.shape
    assert (n1, n2) == tuple(n_list)
    N = n1 * n2
    RR = r1 * r2
    B = indices.shape[0]

    # Pre-permute the core to a lane-dense (RR, N) slab (tiny XLA op in the wrapper):
    #   pt[i*r2 + j, a*n2 + b] = p[i, a, b, j]
    pt = jnp.transpose(p, (0, 3, 1, 2)).reshape(RR, N)

    # Linearized indices into the fused n1*n2 axis.  Clamp keeps genuinely
    # out-of-range user indices mapped to a valid row (PyTorch would raise);
    # the one-hot gather itself can never read out of bounds.
    lin = indices[:, 0].astype(jnp.int32) * n2 + indices[:, 1].astype(jnp.int32)
    lin = jnp.clip(lin, 0, N - 1)

    # Batch tile: multiple of 128 (lane width) for an unmasked lane-dense output.
    tb = _round_up(min(batch_tile, max(B, 1)), 128)
    num_tiles = -(-B // tb)
    b_pad = num_tiles * tb
    lin = jnp.pad(lin, (0, b_pad - B)).reshape(1, b_pad)

    sel_t = pl.pallas_call(
        gather_kernel,
        out_shape=jax.ShapeDtypeStruct((RR, b_pad), p.dtype),
        grid_spec=pltpu.PrefetchScalarGridSpec(
            num_scalar_prefetch=0,
            grid=(num_tiles,),
            in_specs=[
                # Per-tile slice of the linearized indices (VMEM, vectorized compare).
                pl.BlockSpec((1, tb), lambda b: (0, b)),
                # Core stays resident: same block index for every grid step.
                pl.BlockSpec((RR, N), lambda b: (0, 0)),
            ],
            out_specs=pl.BlockSpec((RR, tb), lambda b: (0, b)),
        ),
        # No revisited output block and no init branch -> batch tiles are fully
        # independent and can shard across TensorCores (v7x).
        compiler_params=pltpu.CompilerParams(
            dimension_semantics=("parallel",),
        ),
    )(lin, pt)

    # Tiny wrapper-side transpose/reshape back to the module's output layout.
    sel = sel_t[:, :B].T.reshape(B, r1, r2)

    # reg = broadcast of sum_{n-modes} core**2.  Computed in plain XLA (f32 accum)
    # per the perf review: it is O(r1*n1*n2*r2) and keeping it out of the kernel
    # is what allows the "parallel" batch axis above.
    reg_vals = jnp.sum(p.astype(jnp.float32) ** 2, axis=(1, 2), keepdims=True)
    reg = jnp.broadcast_to(reg_vals.astype(p.dtype), p.shape)
    return sel, reg


if __name__ == "__main__":
    key = jax.random.PRNGKey(0)

    # TT_component(r_1=4, n_list=[8, 16], r_2=4, init_scale=1.0)
    r1, r2 = 4, 4
    n_list = (8, 16)
    B = 8
    init_scale = 1.0

    kp, ka, kb = jax.random.split(key, 3)
    p = init_scale * jax.random.normal(
        kp, (r1, n_list[0], n_list[1], r2), dtype=jnp.float32
    )
    idx0 = jax.random.randint(ka, (B,), 0, n_list[0])
    idx1 = jax.random.randint(kb, (B,), 0, n_list[1])
    indices = jnp.stack([idx0, idx1], axis=1).astype(jnp.int32)  # [B, len(n_list)]

    fwd = jax.jit(functools.partial(tt_forward, n_list=n_list))
    sel, reg = fwd(p, indices)
    jax.block_until_ready((sel, reg))

    # Pure-JAX reference check of the PyTorch semantics.
    sel_ref = jnp.transpose(p, (1, 2, 0, 3))[indices[:, 0], indices[:, 1]]
    reg_ref = jnp.broadcast_to(
        jnp.sum(p**2, axis=(1, 2), keepdims=True), p.shape
    )
    assert sel.shape == (B, r1, r2)
    assert reg.shape == p.shape
    assert jnp.allclose(sel, sel_ref, atol=1e-5, rtol=1e-5), "index-select mismatch"
    assert jnp.allclose(reg, reg_ref, atol=1e-4, rtol=1e-4), "reg-term mismatch"

    print("KERNEL_OK")
</pallas_src>

<mosaic_0001>
module attributes {stable_mosaic.version = 11 : i64} {
  func.func @gather_kernel(%arg0: i32, %arg1: memref<1x128xi32, #tpu.memory_space<vmem>>, %arg2: memref<16x128xf32, #tpu.memory_space<vmem>>, %arg3: memref<16x128xf32, #tpu.memory_space<vmem>>) attributes {dimension_semantics = [#tpu.dimension_semantics<parallel>], iteration_bounds = array<i64: 1>, scalar_prefetch = 0 : i64, scratch_operands = 0 : i64, tpu.core_type = #tpu.core_type<tc>, window_params = [{transform_indices = @transform_0, window_bounds = array<i64: 1, 128>}, {pipeline_mode = #tpu.pipeline_mode<synchronous>, transform_indices = @transform_1, window_bounds = array<i64: 16, 128>}, {transform_indices = @transform_2, window_bounds = array<i64: 16, 128>}]} {
    %0 = tpu.iota {dimensions = array<i32: 0>} : vector<128x128xi32>
    %c0 = arith.constant 0 : index
    %c0_0 = arith.constant 0 : index
    %1 = vector.load %arg1[%c0, %c0_0] : memref<1x128xi32, #tpu.memory_space<vmem>>, vector<1x128xi32>
    %2 = vector.broadcast %1 : vector<1x128xi32> to vector<128x128xi32>
    %3 = arith.cmpi eq, %0, %2 : vector<128x128xi32>
    %4 = arith.extui %3 : vector<128x128xi1> to vector<128x128xi32>
    %5 = arith.sitofp %4 : vector<128x128xi32> to vector<128x128xf32>
    %c0_1 = arith.constant 0 : index
    %c0_2 = arith.constant 0 : index
    %6 = vector.load %arg2[%c0_1, %c0_2] : memref<16x128xf32, #tpu.memory_space<vmem>>, vector<16x128xf32>
    %cst = arith.constant dense<0.000000e+00> : vector<16x128xf32>
    %7 = tpu.matmul %6, %5, %cst {dimension_numbers = #tpu.dot_dimension_numbers<[1], [0], [0], [1], [0, 0, 1, 1], [], []>} : vector<16x128xf32>, vector<128x128xf32>, vector<16x128xf32> -> vector<16x128xf32>
    %c0_3 = arith.constant 0 : index
    %c0_4 = arith.constant 0 : index
    %8 = vector.load %arg3[%c0_3, %c0_4] : memref<16x128xf32, #tpu.memory_space<vmem>>, vector<16x128xf32>
    tpu.vector_store %arg3[%c0_3, %c0_4], %7 {strides = array<i32>} : memref<16x128xf32, #tpu.memory_space<vmem>>, vector<16x128xf32>,
    return
  }
  func.func @transform_0(%arg0: i32) -> (i32, i32) {
    %c0_i32 = arith.constant 0 : i32
    %c0_i32_0 = arith.constant 0 : i32
    return %c0_i32, %arg0 : i32, i32
  }
  func.func @transform_1(%arg0: i32) -> (i32, i32) {
    %c0_i32 = arith.constant 0 : i32
    %c0_i32_0 = arith.constant 0 : i32
    %c0_i32_1 = arith.constant 0 : i32
    return %c0_i32, %c0_i32_0 : i32, i32
  }
  func.func @transform_2(%arg0: i32) -> (i32, i32) {
    %c0_i32 = arith.constant 0 : i32
    %c0_i32_0 = arith.constant 0 : i32
    return %c0_i32, %arg0 : i32, i32
  }
}

</mosaic_0001>

<bundles_post_ra>
// kernel: tt_forward.1
= control target key start
LH: loop header
LB: loop body
LE: loop exit
PB: predicated region body
PF: predicated region fallthrough
CT: control target
= control target key end

     0   :  { %v12_v0 = vlaneseq  ;;  %s270_s0 = inlined_call_operand.vmem [shape: s32[1,128], index: 0, kind: input, shape index: {}]   ;;  %s271_s1 = inlined_call_operand.vmem [shape: f32[16,128], index: 1, kind: input, shape index: {}]   ;;  %s272_s2 = inlined_call_operand.hbm [shape: f32[16,128], index: 2, kind: output, shape index: {}]  }
   0x1   :  { %7 = vsyncpa [#allocation3], 0  ;;  %v227_v2 = vld [vmem:[%s270_s0] ss:$0 sm:$0xff]  ;;  %v203_v7 = vmov 1.0   ;;  %v80_v20 = vld [vmem:[%s271_s1 + $0x8] sm:$0xff] }
   0x2   :  { %v222_v1 = vshrl.u32 %v12_v0, 7  ;;  %v79_v19 = vld [vmem:[%s271_s1] sm:$0xff]  ;;  %s204_s14 = smov [#allocation2]   ;;  %s112_s18 = sshll.u32 %s272_s2, 4  ;;  %s113_s18 = int_to_ptr.hbm [resolvable:$true] %s112_s18 }
   0x3   :  { %s110_s15 = sshll.u32 %s204_s14, 4  ;;  %s205_s19 = smov 128   ;;  %s111_s15 = int_to_ptr.vmem [resolvable:$true] %s110_s15 }
   0x4   :  { %v28_v3 = vadd.s32 120, %v222_v1  ;;  %v27_v4 = vadd.s32 112, %v222_v1  ;;  %v26_v5 = vadd.s32 104, %v222_v1  ;;  %v25_v6 = vadd.s32 96, %v222_v1  ;;  %s206_s20 = smov 8  }
   0x5   :  { %v24_v8 = vadd.s32 88, %v222_v1  ;;  %v23_v9 = vadd.s32 80, %v222_v1  ;;  %v22_v10 = vadd.s32 72, %v222_v1  ;;  %v21_v11 = vadd.s32 64, %v222_v1 }
   0x6   :  { %vm46_vm0 = vcmp.eq.s32.totalorder %v28_v3, %v227_v2  ;;  %vm45_vm1 = vcmp.eq.s32.totalorder %v27_v4, %v227_v2  ;;  %vm44_vm2 = vcmp.eq.s32.totalorder %v26_v5, %v227_v2  ;;  %vm43_vm3 = vcmp.eq.s32.totalorder %v25_v6, %v227_v2 }
   0x7   :  { %140 = vmatpush.msk.msra.mxu0 %vm46_vm0, %v203_v7  ;;  %156 = vmatpush.msk.msra.mxu1 %vm46_vm0, %v203_v7  ;;  %vm42_vm4 = vcmp.eq.s32.totalorder %v24_v8, %v227_v2  ;;  %vm41_vm5 = vcmp.eq.s32.totalorder %v23_v9, %v227_v2  ;;  %vm40_vm6 = vcmp.eq.s32.totalorder %v22_v10, %v227_v2  ;;  %v20_v12 = vadd.s32 56, %v222_v1 }
   0x8   :  { %vm39_vm7 = vcmp.eq.s32.totalorder %v21_v11, %v227_v2  ;;  %v19_v13 = vadd.s32 48, %v222_v1  ;;  %v18_v14 = vadd.s32 40, %v222_v1  ;;  %v17_v15 = vadd.s32 32, %v222_v1 }
   0x9   :  { %141 = vmatpush.msk.msra.mxu0 %vm45_vm1, %v203_v7  ;;  %157 = vmatpush.msk.msra.mxu1 %vm45_vm1, %v203_v7  ;;  %vm38_vm8 = vcmp.eq.s32.totalorder %v20_v12, %v227_v2  ;;  %v16_v16 = vadd.s32 24, %v222_v1  ;;  %v15_v17 = vadd.s32 16, %v222_v1  ;;  %v14_v18 = vadd.s32 8, %v222_v1 }
   0xa   :  { %vm37_vm9 = vcmp.eq.s32.totalorder %v19_v13, %v227_v2  ;;  %vm36_vm10 = vcmp.eq.s32.totalorder %v18_v14, %v227_v2  ;;  %vm35_vm11 = vcmp.eq.s32.totalorder %v17_v15, %v227_v2  ;;  %vm31_vm15 = vcmp.eq.s32.totalorder %v222_v1, %v227_v2 }
   0xb   :  { %142 = vmatpush.msk.msra.mxu0 %vm44_vm2, %v203_v7  ;;  %158 = vmatpush.msk.msra.mxu1 %vm44_vm2, %v203_v7  ;;  %vm34_vm12 = vcmp.eq.s32.totalorder %v16_v16, %v227_v2  ;;  %vm33_vm13 = vcmp.eq.s32.totalorder %v15_v17, %v227_v2  ;;  %vm32_vm14 = vcmp.eq.s32.totalorder %v14_v18, %v227_v2 }
   0xd   :  { %143 = vmatpush.msk.msra.mxu0 %vm43_vm3, %v203_v7  ;;  %159 = vmatpush.msk.msra.mxu1 %vm43_vm3, %v203_v7 }
   0xf   :  { %144 = vmatpush.msk.msra.mxu0 %vm42_vm4, %v203_v7  ;;  %160 = vmatpush.msk.msra.mxu1 %vm42_vm4, %v203_v7 }
  0x11   :  { %145 = vmatpush.msk.msra.mxu0 %vm41_vm5, %v203_v7  ;;  %161 = vmatpush.msk.msra.mxu1 %vm41_vm5, %v203_v7 }
  0x13   :  { %146 = vmatpush.msk.msra.mxu0 %vm40_vm6, %v203_v7  ;;  %162 = vmatpush.msk.msra.mxu1 %vm40_vm6, %v203_v7 }
  0x15   :  { %147 = vmatpush.msk.msra.mxu0 %vm39_vm7, %v203_v7  ;;  %163 = vmatpush.msk.msra.mxu1 %vm39_vm7, %v203_v7 }
  0x17   :  { %148 = vmatpush.msk.msra.mxu0 %vm38_vm8, %v203_v7  ;;  %164 = vmatpush.msk.msra.mxu1 %vm38_vm8, %v203_v7 }
  0x19   :  { %149 = vmatpush.msk.msra.mxu0 %vm37_vm9, %v203_v7  ;;  %165 = vmatpush.msk.msra.mxu1 %vm37_vm9, %v203_v7 }
  0x1b   :  { %150 = vmatpush.msk.msra.mxu0 %vm36_vm10, %v203_v7  ;;  %166 = vmatpush.msk.msra.mxu1 %vm36_vm10, %v203_v7 }
  0x1d   :  { %151 = vmatpush.msk.msra.mxu0 %vm35_vm11, %v203_v7  ;;  %167 = vmatpush.msk.msra.mxu1 %vm35_vm11, %v203_v7 }
  0x1f   :  { %152 = vmatpush.msk.msra.mxu0 %vm34_vm12, %v203_v7  ;;  %168 = vmatpush.msk.msra.mxu1 %vm34_vm12, %v203_v7 }
  0x21   :  { %153 = vmatpush.msk.msra.mxu0 %vm33_vm13, %v203_v7  ;;  %169 = vmatpush.msk.msra.mxu1 %vm33_vm13, %v203_v7 }
  0x23   :  { %154 = vmatpush.msk.msra.mxu0 %vm32_vm14, %v203_v7  ;;  %170 = vmatpush.msk.msra.mxu1 %vm32_vm14, %v203_v7 }
  0x25   :  { %155 = vmatpush.msk.msra.mxu0 %vm31_vm15, %v203_v7  ;;  %171 = vmatpush.msk.msra.mxu1 %vm31_vm15, %v203_v7 }
  0x26   :  { %97 = vmatmul.f32.vlgmr.msra.gmra.mxu0 %v79_v19  ;;  %100 = vmatmul.f32.vlgmr.msra.gmra.mxu1 %v80_v20 }
  0xa3   :  { %v98_v21 = vpop.f32.mrf.mxu0  ;;  %v101_v22 = vpop.f32.mrf.mxu1 }
  0xa4   :  { %104 = vst [vmem:[#allocation2] sm:$0xff] %v98_v21 }
  0xa5   :  { %105 = vst [vmem:[#allocation2 + $0x8] sm:$0xff] %v101_v22 }
  0xa6   :  { %118 = dma.vmem_to_hbm [thread:$0]  %s111_s15, 256, %s113_s18, [#allocation3], %s205_s19, %s205_s19, %s206_s20  }
  0xa7   :  { %201 = dma.done.wait [#allocation3], 256  }
  0xa8   :  { %202 = vsyncadd [#allocation3], 4294967040 }
  0xa9   :  { %123 = vsyncpa [#allocation3], 1 }

</bundles_post_ra>
